<compile_context>
chip_gen: v5e
topology: v5e:2x2
jax: 0.10.0
libtpu: 0.0.40
codegen_flags: <defaults>
</compile_context>

<pallas_src>
import functools

import jax
import jax.numpy as jnp
from jax.experimental import pallas as pl
from jax.experimental.pallas import tpu as pltpu

_LANES = 128


def _round_up(x, m):
    return (x + m - 1) // m * m


def _pick_row_tile(m, cap=512):
    """Largest row tile <= cap that divides m (multiple of 8), else full m."""
    if m <= cap:
        return m
    for t in range(cap, 7, -1):
        if m % t == 0 and t % 8 == 0:
            return t
    return m


def _deconv_bn_relu_kernel(*refs, ks):
    # refs = (x_kd0, ..., x_kd{ks-1}, w, scale, shift, out)
    #   x_kd*:  (Mt, ks*ks*Cin)  bf16  -- im2col rows of input D-slice (d + kd)
    #   w:      (ks, ks*ks*Cin, Cpad) bf16  -- flipped/transposed, Cout padded to 128
    #   scale:  (1, Cpad) f32   folded BN scale  = gamma / sqrt(var + eps)
    #   shift:  (1, Cpad) f32   folded BN shift  = beta - mean * scale
    #   out:    (Mt, Cpad) f32
    x_refs = refs[:ks]
    w_ref, scale_ref, shift_ref, o_ref = refs[ks:]

    # ks clean 2-D MXU matmuls, K = ks*ks*Cin, f32 accumulation.
    acc = jnp.dot(x_refs[0][...], w_ref[0], preferred_element_type=jnp.float32)
    for kd in range(1, ks):
        acc = acc + jnp.dot(x_refs[kd][...], w_ref[kd],
                            preferred_element_type=jnp.float32)

    # Fused inference BatchNorm + ReLU epilogue, kept in f32.
    y = acc * scale_ref[...] + shift_ref[...]
    o_ref[...] = jnp.maximum(y, 0.0).astype(o_ref.dtype)


def basic_deconvolution_block(x_ncdhw, w_t, gamma, beta, running_mean,
                              running_var, *, ks=3, eps=1e-5):
    """Dense analog of BasicDeconvolutionBlock forward.

    x_ncdhw: (N, Cin, D, H, W) float32
    w_t:     (Cin, Cout, ks, ks, ks)  -- PyTorch ConvTranspose3d weight layout
    returns: (N, Cout, D+ks-1, H+ks-1, W+ks-1) float32
    """
    N, Cin, D, H, W = x_ncdhw.shape
    Cout = w_t.shape[1]
    p = ks - 1
    Do, Ho, Wo = D + p, H + p, W + p
    Dp = D + 2 * p
    Cpad = _round_up(max(Cout, _LANES), _LANES)      # lane-dense output channels
    K = ks * ks * Cin                                # MXU contraction depth
    M = Ho * Wo                                      # output rows per D-slice
    Mt = _pick_row_tile(M)
    n_mt = M // Mt

    # ---- wrapper glue (plain JAX): layout, pad, (kh,kw)-im2col, weight prep ----
    # TODO(synk): the pad + im2col could be folded into the kernel with border
    #             masking to save wrapper-side HBM traffic at very large volumes.
    xb = jnp.transpose(x_ncdhw, (0, 2, 3, 4, 1)).astype(jnp.bfloat16)   # NDHWC
    x_pad = jnp.pad(xb, ((0, 0), (p, p), (p, p), (p, p), (0, 0)))
    # feature index = (kh*ks + kw)*Cin + ci
    cols = [x_pad[:, :, kh:kh + Ho, kw:kw + Wo, :]
            for kh in range(ks) for kw in range(ks)]
    x_cols = jnp.concatenate(cols, axis=-1).reshape(N, Dp, M, K)

    # Transposed conv as conv with flipped / channel-transposed weight:
    #   w_conv[kd,kh,kw,ci,co] = w_t[ci, co, ks-1-kd, ks-1-kh, ks-1-kw]
    w_conv = jnp.transpose(w_t[:, :, ::-1, ::-1, ::-1], (2, 3, 4, 0, 1))
    w_conv = jnp.pad(w_conv, ((0, 0),) * 4 + ((0, Cpad - Cout),))
    w_r = w_conv.reshape(ks, K, Cpad).astype(jnp.bfloat16)

    # Folded inference BatchNorm (f32).
    scale = (gamma / jnp.sqrt(running_var + eps)).astype(jnp.float32)
    shift = (beta - running_mean * scale).astype(jnp.float32)
    scale = jnp.pad(scale, (0, Cpad - Cout)).reshape(1, Cpad)
    shift = jnp.pad(shift, (0, Cpad - Cout)).reshape(1, Cpad)

    kernel = functools.partial(_deconv_bn_relu_kernel, ks=ks)

    # D-halo via ks shifted views of the same im2col tensor (block size 1 along D).
    x_specs = [
        pl.BlockSpec((None, None, Mt, K),
                     lambda n, d, m, kd=kd: (n, d + kd, m, 0))
        for kd in range(ks)
    ]

    cost = pl.CostEstimate(
        flops=2 * N * Do * M * ks * ks * ks * Cin * Cout,
        transcendentals=0,
        bytes_accessed=(ks * x_cols.size * x_cols.dtype.itemsize
                        + w_r.size * w_r.dtype.itemsize
                        + N * Do * M * Cpad * 4))

    out = pl.pallas_call(
        kernel,
        out_shape=jax.ShapeDtypeStruct((N, Do, M, Cpad), jnp.float32),
        grid_spec=pltpu.PrefetchScalarGridSpec(
            num_scalar_prefetch=0,
            grid=(N, Do, n_mt),
            in_specs=x_specs + [
                # constant index maps -> weight / BN params fetched once and
                # kept VMEM-resident across the whole grid.
                pl.BlockSpec((ks, K, Cpad), lambda n, d, m: (0, 0, 0)),
                pl.BlockSpec((1, Cpad), lambda n, d, m: (0, 0)),
                pl.BlockSpec((1, Cpad), lambda n, d, m: (0, 0)),
            ],
            out_specs=pl.BlockSpec((None, None, Mt, Cpad),
                                   lambda n, d, m: (n, d, m, 0)),
        ),
        compiler_params=pltpu.CompilerParams(
            dimension_semantics=("parallel", "parallel", "parallel"),
            vmem_limit_bytes=32 * 1024 * 1024),
        cost_estimate=cost,
    )(*([x_cols] * ks), w_r, scale, shift)

    out = out[..., :Cout].reshape(N, Do, Ho, Wo, Cout)
    return jnp.transpose(out, (0, 4, 1, 2, 3))      # NDHWC -> NCDHW


def _reference(x_ncdhw, w_t, gamma, beta, running_mean, running_var,
               *, ks=3, eps=1e-5):
    """Pure-JAX reference with the same dense semantics.

    Inputs are rounded to bf16 exactly as in the kernel path (the only intended
    numerical deviation); accumulation and the BN/ReLU epilogue are f32.
    """
    N, Cin, D, H, W = x_ncdhw.shape
    Cout = w_t.shape[1]
    p = ks - 1
    Do, Ho, Wo = D + p, H + p, W + p
    x = jnp.transpose(x_ncdhw, (0, 2, 3, 4, 1)).astype(jnp.bfloat16).astype(jnp.float32)
    x_pad = jnp.pad(x, ((0, 0), (p, p), (p, p), (p, p), (0, 0)))
    w_conv = jnp.transpose(w_t[:, :, ::-1, ::-1, ::-1], (2, 3, 4, 0, 1))
    w_conv = w_conv.astype(jnp.bfloat16).astype(jnp.float32)
    acc = jnp.zeros((N, Do, Ho, Wo, Cout), jnp.float32)
    for kd in range(ks):
        for kh in range(ks):
            for kw in range(ks):
                patch = x_pad[:, kd:kd + Do, kh:kh + Ho, kw:kw + Wo, :]
                acc = acc + jnp.einsum("ndhwi,io->ndhwo", patch,
                                       w_conv[kd, kh, kw])
    scale = gamma / jnp.sqrt(running_var + eps)
    shift = beta - running_mean * scale
    y = jnp.maximum(acc * scale + shift, 0.0)
    return jnp.transpose(y, (0, 4, 1, 2, 3))


if __name__ == "__main__":
    key = jax.random.PRNGKey(0)
    k_x, k_w, k_g, k_b, k_m, k_v = jax.random.split(key, 6)

    N, Cin, Cout = 2, 4, 8
    D = H = W = 8
    ks = 3

    x = jax.random.normal(k_x, (N, Cin, D, H, W), dtype=jnp.float32)
    # ConvTranspose3d weight layout: (Cin, Cout, ks, ks, ks)
    w_t = jax.random.normal(k_w, (Cin, Cout, ks, ks, ks), dtype=jnp.float32) * 0.1
    gamma = 1.0 + 0.1 * jax.random.normal(k_g, (Cout,), dtype=jnp.float32)
    beta = 0.1 * jax.random.normal(k_b, (Cout,), dtype=jnp.float32)
    running_mean = 0.05 * jax.random.normal(k_m, (Cout,), dtype=jnp.float32)
    running_var = 1.0 + 0.1 * jnp.abs(jax.random.normal(k_v, (Cout,),
                                                        dtype=jnp.float32))

    out = basic_deconvolution_block(x, w_t, gamma, beta, running_mean,
                                    running_var, ks=ks)
    out = jax.block_until_ready(out)

    ref = _reference(x, w_t, gamma, beta, running_mean, running_var, ks=ks)
    assert out.shape == (N, Cout, D + ks - 1, H + ks - 1, W + ks - 1)
    assert jnp.allclose(out, ref, atol=5e-3, rtol=5e-3), (
        "mismatch vs reference: max abs diff = %g"
        % float(jnp.max(jnp.abs(out - ref))))

    print("KERNEL_OK")
</pallas_src>

<mosaic_0001>
module attributes {stable_mosaic.version = 11 : i64} {
  func.func @_deconv_bn_relu_kernel(%arg0: i32, %arg1: i32, %arg2: i32, %arg3: memref<1x1x100x36xbf16, #tpu.memory_space<vmem>>, %arg4: memref<1x1x100x36xbf16, #tpu.memory_space<vmem>>, %arg5: memref<1x1x100x36xbf16, #tpu.memory_space<vmem>>, %arg6: memref<3x36x128xbf16, #tpu.memory_space<vmem>>, %arg7: memref<1x128xf32, #tpu.memory_space<vmem>>, %arg8: memref<1x128xf32, #tpu.memory_space<vmem>>, %arg9: memref<1x1x100x128xf32, #tpu.memory_space<vmem>>) attributes {dimension_semantics = [#tpu.dimension_semantics<parallel>, #tpu.dimension_semantics<parallel>, #tpu.dimension_semantics<parallel>], iteration_bounds = array<i64: 2, 10, 1>, scalar_prefetch = 0 : i64, scratch_operands = 0 : i64, tpu.core_type = #tpu.core_type<tc>, window_params = [{transform_indices = @transform_0, window_bounds = array<i64: 1, 1, 100, 36>}, {transform_indices = @transform_1, window_bounds = array<i64: 1, 1, 100, 36>}, {transform_indices = @transform_2, window_bounds = array<i64: 1, 1, 100, 36>}, {pipeline_mode = #tpu.pipeline_mode<synchronous>, transform_indices = @transform_3, window_bounds = array<i64: 3, 36, 128>}, {pipeline_mode = #tpu.pipeline_mode<synchronous>, transform_indices = @transform_4, window_bounds = array<i64: 1, 128>}, {pipeline_mode = #tpu.pipeline_mode<synchronous>, transform_indices = @transform_5, window_bounds = array<i64: 1, 128>}, {transform_indices = @transform_6, window_bounds = array<i64: 1, 1, 100, 128>}]} {
    %c0 = arith.constant 0 : index
    %c0_0 = arith.constant 0 : index
    %c0_1 = arith.constant 0 : index
    %c0_2 = arith.constant 0 : index
    %0 = vector.load %arg3[%c0, %c0_0, %c0_1, %c0_2] : memref<1x1x100x36xbf16, #tpu.memory_space<vmem>>, vector<1x1x100x36xbf16>
    %1 = vector.shape_cast %0 : vector<1x1x100x36xbf16> to vector<100x36xbf16>
    %c0_3 = arith.constant 0 : index
    %c0_4 = arith.constant 0 : index
    %c0_5 = arith.constant 0 : index
    %2 = vector.load %arg6[%c0_3, %c0_4, %c0_5] : memref<3x36x128xbf16, #tpu.memory_space<vmem>>, vector<1x36x128xbf16>
    %3 = vector.shape_cast %2 : vector<1x36x128xbf16> to vector<36x128xbf16>
    %cst = arith.constant dense<0.000000e+00> : vector<100x128xf32>
    %4 = tpu.matmul %1, %3, %cst {dimension_numbers = #tpu.dot_dimension_numbers<[1], [0], [0], [1], [0, 0, 1, 1], [], []>} : vector<100x36xbf16>, vector<36x128xbf16>, vector<100x128xf32> -> vector<100x128xf32>
    %c0_6 = arith.constant 0 : index
    %c0_7 = arith.constant 0 : index
    %c0_8 = arith.constant 0 : index
    %c0_9 = arith.constant 0 : index
    %5 = vector.load %arg4[%c0_6, %c0_7, %c0_8, %c0_9] : memref<1x1x100x36xbf16, #tpu.memory_space<vmem>>, vector<1x1x100x36xbf16>
    %6 = vector.shape_cast %5 : vector<1x1x100x36xbf16> to vector<100x36xbf16>
    %c1 = arith.constant 1 : index
    %c0_10 = arith.constant 0 : index
    %c0_11 = arith.constant 0 : index
    %7 = vector.load %arg6[%c1, %c0_10, %c0_11] : memref<3x36x128xbf16, #tpu.memory_space<vmem>>, vector<1x36x128xbf16>
    %8 = vector.shape_cast %7 : vector<1x36x128xbf16> to vector<36x128xbf16>
    %cst_12 = arith.constant dense<0.000000e+00> : vector<100x128xf32>
    %9 = tpu.matmul %6, %8, %cst_12 {dimension_numbers = #tpu.dot_dimension_numbers<[1], [0], [0], [1], [0, 0, 1, 1], [], []>} : vector<100x36xbf16>, vector<36x128xbf16>, vector<100x128xf32> -> vector<100x128xf32>
    %10 = arith.addf %4, %9 : vector<100x128xf32>
    %c0_13 = arith.constant 0 : index
    %c0_14 = arith.constant 0 : index
    %c0_15 = arith.constant 0 : index
    %c0_16 = arith.constant 0 : index
    %11 = vector.load %arg5[%c0_13, %c0_14, %c0_15, %c0_16] : memref<1x1x100x36xbf16, #tpu.memory_space<vmem>>, vector<1x1x100x36xbf16>
    %12 = vector.shape_cast %11 : vector<1x1x100x36xbf16> to vector<100x36xbf16>
    %c2 = arith.constant 2 : index
    %c0_17 = arith.constant 0 : index
    %c0_18 = arith.constant 0 : index
    %13 = vector.load %arg6[%c2, %c0_17, %c0_18] : memref<3x36x128xbf16, #tpu.memory_space<vmem>>, vector<1x36x128xbf16>
    %14 = vector.shape_cast %13 : vector<1x36x128xbf16> to vector<36x128xbf16>
    %cst_19 = arith.constant dense<0.000000e+00> : vector<100x128xf32>
    %15 = tpu.matmul %12, %14, %cst_19 {dimension_numbers = #tpu.dot_dimension_numbers<[1], [0], [0], [1], [0, 0, 1, 1], [], []>} : vector<100x36xbf16>, vector<36x128xbf16>, vector<100x128xf32> -> vector<100x128xf32>
    %16 = arith.addf %10, %15 : vector<100x128xf32>
    %c0_20 = arith.constant 0 : index
    %c0_21 = arith.constant 0 : index
    %17 = vector.load %arg7[%c0_20, %c0_21] : memref<1x128xf32, #tpu.memory_space<vmem>>, vector<1x128xf32>
    %18 = vector.broadcast %17 : vector<1x128xf32> to vector<100x128xf32>
    %19 = arith.mulf %16, %18 : vector<100x128xf32>
    %c0_22 = arith.constant 0 : index
    %c0_23 = arith.constant 0 : index
    %20 = vector.load %arg8[%c0_22, %c0_23] : memref<1x128xf32, #tpu.memory_space<vmem>>, vector<1x128xf32>
    %21 = vector.broadcast %20 : vector<1x128xf32> to vector<100x128xf32>
    %22 = arith.addf %19, %21 : vector<100x128xf32>
    %cst_24 = arith.constant 0.000000e+00 : f32
    %23 = vector.broadcast %cst_24 : f32 to vector<100x128xf32>
    %24 = arith.maximumf %22, %23 : vector<100x128xf32>
    %c0_25 = arith.constant 0 : index
    %c0_26 = arith.constant 0 : index
    %c0_27 = arith.constant 0 : index
    %c0_28 = arith.constant 0 : index
    %25 = vector.load %arg9[%c0_25, %c0_26, %c0_27, %c0_28] : memref<1x1x100x128xf32, #tpu.memory_space<vmem>>, vector<1x1x100x128xf32>
    %26 = vector.shape_cast %25 : vector<1x1x100x128xf32> to vector<100x128xf32>
    %27 = vector.shape_cast %24 : vector<100x128xf32> to vector<1x1x100x128xf32>
    tpu.vector_store %arg9[%c0_25, %c0_26, %c0_27, %c0_28], %27 {strides = array<i32>} : memref<1x1x100x128xf32, #tpu.memory_space<vmem>>, vector<1x1x100x128xf32>,
    return
  }
  func.func @transform_0(%arg0: i32, %arg1: i32, %arg2: i32) -> (i32, i32, i32, i32) {
    %c0_i32 = arith.constant 0 : i32
    %0 = arith.addi %arg1, %c0_i32 : i32
    %c0_i32_0 = arith.constant 0 : i32
    %c0_i32_1 = arith.constant 0 : i32
    return %arg0, %0, %arg2, %c0_i32_0 : i32, i32, i32, i32
  }
  func.func @transform_1(%arg0: i32, %arg1: i32, %arg2: i32) -> (i32, i32, i32, i32) {
    %c1_i32 = arith.constant 1 : i32
    %0 = arith.addi %arg1, %c1_i32 : i32
    %c0_i32 = arith.constant 0 : i32
    %c0_i32_0 = arith.constant 0 : i32
    return %arg0, %0, %arg2, %c0_i32 : i32, i32, i32, i32
  }
  func.func @transform_2(%arg0: i32, %arg1: i32, %arg2: i32) -> (i32, i32, i32, i32) {
    %c2_i32 = arith.constant 2 : i32
    %0 = arith.addi %arg1, %c2_i32 : i32
    %c0_i32 = arith.constant 0 : i32
    %c0_i32_0 = arith.constant 0 : i32
    return %arg0, %0, %arg2, %c0_i32 : i32, i32, i32, i32
  }
  func.func @transform_3(%arg0: i32, %arg1: i32, %arg2: i32) -> (i32, i32, i32) {
    %c0_i32 = arith.constant 0 : i32
    %c0_i32_0 = arith.constant 0 : i32
    %c0_i32_1 = arith.constant 0 : i32
    %c0_i32_2 = arith.constant 0 : i32
    return %c0_i32, %c0_i32_0, %c0_i32_1 : i32, i32, i32
  }
  func.func @transform_4(%arg0: i32, %arg1: i32, %arg2: i32) -> (i32, i32) {
    %c0_i32 = arith.constant 0 : i32
    %c0_i32_0 = arith.constant 0 : i32
    %c0_i32_1 = arith.constant 0 : i32
    return %c0_i32, %c0_i32_0 : i32, i32
  }
  func.func @transform_5(%arg0: i32, %arg1: i32, %arg2: i32) -> (i32, i32) {
    %c0_i32 = arith.constant 0 : i32
    %c0_i32_0 = arith.constant 0 : i32
    %c0_i32_1 = arith.constant 0 : i32
    return %c0_i32, %c0_i32_0 : i32, i32
  }
  func.func @transform_6(%arg0: i32, %arg1: i32, %arg2: i32) -> (i32, i32, i32, i32) {
    %c0_i32 = arith.constant 0 : i32
    %c0_i32_0 = arith.constant 0 : i32
    return %arg0, %arg1, %arg2, %c0_i32 : i32, i32, i32, i32
  }
}

</mosaic_0001>

<bundles_post_ra>
// kernel: tpu_custom_call.1
= control target key start
LH: loop header
LB: loop body
LE: loop exit
PB: predicated region body
PF: predicated region fallthrough
CT: control target
= control target key end

     0   :  { %s1370_s21 = smov 0   ;;  %s1372_s22 = smov 0   ;;  %s1572_s0 = inlined_call_operand.vmem [shape: bf16[2,12,100,36], index: 0, kind: input, shape index: {}]   ;;  %s1573_s1 = inlined_call_operand.vmem [shape: bf16[2,12,100,36], index: 1, kind: input, shape index: {}]   ;;  %s1574_s2 = inlined_call_operand.vmem [shape: bf16[2,12,100,36], index: 2, kind: input, shape index: {}]   ;;  %s1575_s3 = inlined_call_operand.vmem [shape: bf16[3,36,128], index: 3, kind: input, shape index: {}]   ;;  %s1576_s4 = inlined_call_operand.vmem [shape: f32[1,128], index: 4, kind: input, shape index: {}]   ;;  %s1577_s5 = inlined_call_operand.vmem [shape: f32[1,128], index: 5, kind: input, shape index: {}]   ;;  %s1578_s6 = inlined_call_operand.vmem [shape: f32[2,10,100,128], index: 6, kind: output, shape index: {}]  }
   0x1   :  { %s1374_s23 = smov 0   ;;  %s1376_s24 = smov 0  }
   0x2   :  { %s1378_s25 = smov 0  }
   0x3 LB: > { %s31_s26 = sadd.s32 1, %s1325_s23  ;;  %s35_s27 = sadd.s32 1, %s1329_s24  ;;  %s1333_s25 = sphi %s1378_s25, %s16_s25   ;;  %s1329_s24 = sphi %s1376_s24, %s1582_s24   ;;  %s1325_s23 = sphi %s1374_s23, %s1581_s23   ;;  %s1321_s22 = sphi %s1372_s22, %s1580_s22   ;;  %s1317_s21 = sphi %s1370_s21, %s1579_s21  }
   0x4   : > { %p33_p0 = scmp.ge.s32.totalorder %s31_s26, 10  ;;  %p1080_p1 = scmp.ge.s32.totalorder %s1333_s25, 1 }
   0x5   : > { %p302_p2 = scmp.lt.s32.totalorder %s1333_s25, 21 }
   0x6   : > { %s1584_s26 = smov (%p33_p0, %s31_s26), 0  ;;  %s1586_s27 = smov (!%p33_p0, %s35_s27), %s1329_s24 }
   0x7   : > { %p303_p3 = pnand %p1080_p1, %p302_p2  ;;  %p37_p4 = scmp.ge.s32.totalorder %s1586_s27, 2 }
   0x8   : > { %p377_p5 = scmp.lt.s32.totalorder (!%p303_p3), %s1321_s22, 1  ;;  %s390_s10 = sadd.s32 (!%p303_p3), 1, %s1317_s21 }
   0x9   : > { %s1588_s27 = smov (%p37_p4, %s1586_s27), 0  ;;  %306 = sbr.rel (%p303_p3) target bundleno = 254 (0xfe), region = 44 }
   0xa   : > { %p394_p6 = scmp.lt.s32.totalorder (!%p303_p3), %s390_s10, 11  ;;  %p379_p7 = scmp.lt.s32.totalorder (!%p303_p3), %s1317_s21, 11 }
   0xb   : > { %s406_s17 = sadd.s32 (!%p303_p3), 2, %s1317_s21  ;;  %p425_p9 = scmp.lt.s32.totalorder (!%p303_p3), %s1317_s21, 9 }
   0xc   : > { %p410_p8 = scmp.lt.s32.totalorder (!%p303_p3), %s406_s17, 11 }
   0xe   : > { %v1089_v0 = vld [vmem:[%s1575_s3 + $0x24] sm:$0x3]  ;;  %v454_v1 = vld [vmem:[%s1575_s3 + $0x10] sm:$0x3]  ;;  %v1172_v4 = vld [vmem:[%s1575_s3 + $0x38] sm:$0x3] }
   0xf   : > { %v516_v2 = vunpack.c.l.b16 %v1089_v0  ;;  %v633_v3 = vunpack.c.l.b16 %v454_v1  ;;  %vm544_vm0 = vcmask 1041408   ;;  %v767_v5 = vunpack.c.l.b16 %v1172_v4  ;;  %s1590_s22 = smov (!%p377_p5, %s1321_s22), 1  ;;  %s1592_s10 = smov (!%p394_p6, %s390_s10), 11  ;;  %v1229_v12 = vld [vmem:[%s1575_s3 + $0x1c] sm:$0xff]  ;;  %v1221_v13 = vld [vmem:[%s1575_s3 + $0x8] sm:$0xff]  ;;  %v1237_v14 = vld [vmem:[%s1575_s3 + $0x30] sm:$0xff] }
  0x10   : > { %s1416_s11 = smul.u32 156, %s1590_s22  ;;  %v1228_v15 = vld [vmem:[%s1575_s3 + $0x14] sm:$0xff]  ;;  %v1220_v16 = vld [vmem:[%s1575_s3] sm:$0xff]  ;;  %v1236_v17 = vld [vmem:[%s1575_s3 + $0x28] sm:$0xff]  ;;  %vm522_vm1 = vcmask 293888   ;;  %s1594_s17 = smov (!%p410_p8, %s406_s17), 11 }
  0x11   : > { %v519_v6 = vpack.c.b16 %v516_v2, %v516_v2  ;;  %v636_v7 = vpack.c.b16 %v633_v3, %v633_v3  ;;  %v770_v8 = vpack.c.b16 %v767_v5, %v767_v5  ;;  %s1249_s16 = smul.u32 13, %s1592_s10  ;;  %v1506_v51 = vld [vmem:[%s1576_s4] ss:$0 sm:$0xff] }
  0x12   : > { %s380_s20 = scalar_select %p379_p7, %s1317_s21, 11  ;;  %v1511_v54 = vld [vmem:[%s1577_s5] ss:$0 sm:$0xff] }
  0x13   : > { %v546_v9 = vsel %vm544_vm0, %v519_v6, 0  ;;  %v661_v10 = vsel %vm544_vm0, %v636_v7, 0  ;;  %v795_v11 = vsel %vm544_vm0, %v770_v8, 0  ;;  %s401_s28 = sadd.s32 %s1249_s16, %s1416_s11  ;;  %s1596_s21 = smov (!%p425_p9, %s1317_s21), 9 }
  0x14   : > { %1238 = vmatpush.bf16.msra.mxu3 %v546_v9  ;;  %1241 = vmatpush.bf16.msra.mxu1 %v661_v10  ;;  %s1082_s29 = sshll.u32 %s401_s28, 2  ;;  %s1247_s30 = smul.u32 13, %s380_s20 }
  0x15   : > { %1244 = vmatpush.bf16.msra.mxu2 %v795_v11  ;;  %553 = vmatpush.bf16.msra.mxu0 %v546_v9  ;;  %s1441_s14 = scalar_lea.vmem %s1573_s1, %s1082_s29  ;;  %s1250_s29 = smul.u32 13, %s1594_s17 }
  0x16   : > { %s386_s18 = sadd.s32 %s1416_s11, %s1247_s30  ;;  %v1223_v18 = vld [vmem:[%s1441_s14 + $0x8] sm:$0xff]  ;;  %v1222_v20 = vld [vmem:[%s1441_s14] sm:$0xff]  ;;  %v1224_v22 = vld [vmem:[%s1441_s14 + $0x10] sm:$0xff]  ;;  %s1251_s17 = smul.u32 13, %s1596_s21 }
  0x17   : > { %s1081_s19 = sshll.u32 %s386_s18, 2  ;;  %s417_s30 = sadd.s32 %s1250_s29, %s1416_s11  ;;  %v1225_v26 = vld [vmem:[%s1441_s14 + $0x18] sm:$0xff]  ;;  %v1226_v30 = vld [vmem:[%s1441_s14 + $0x20] sm:$0xff]  ;;  %v1227_v33 = vld [vmem:[%s1441_s14 + $0x28] sm:$0xff] }
  0x18   : > { %1239 = vmatpush.bf16.msra.mxu3 %v1229_v12  ;;  %1242 = vmatpush.bf16.msra.mxu1 %v1221_v13  ;;  %s1451_s7 = scalar_lea.vmem %s1572_s0, %s1081_s19  ;;  %s1083_s8 = sshll.u32 %s417_s30, 2  ;;  %v467_v36 = vld [vmem:[%s1441_s14 + $0x30] sm:$0x3] }
  0x19   : > { %1245 = vmatpush.bf16.msra.mxu2 %v1237_v14  ;;  %554 = vmatpush.bf16.msra.mxu0 %v1229_v12  ;;  %v1215_v19 = vld [vmem:[%s1451_s7 + $0x8] sm:$0xff]  ;;  %s1462_s12 = scalar_lea.vmem %s1574_s2, %s1083_s8  ;;  %v1216_v23 = vld [vmem:[%s1451_s7 + $0x10] sm:$0xff]  ;;  %v1214_v24 = vld [vmem:[%s1451_s7] sm:$0xff]  ;;  %v499_v38 = vunpack.c.l.b16 %v467_v36  ;;  %s1252_s11 = smul.u32 130, %s1590_s22 }
  0x1a   : > { %v1231_v21 = vld [vmem:[%s1462_s12 + $0x8] sm:$0xff]  ;;  %v1232_v25 = vld [vmem:[%s1462_s12 + $0x10] sm:$0xff]  ;;  %v1217_v27 = vld [vmem:[%s1451_s7 + $0x18] sm:$0xff] }
  0x1b   : > { %v1230_v28 = vld [vmem:[%s1462_s12] sm:$0xff]  ;;  %v1233_v29 = vld [vmem:[%s1462_s12 + $0x18] sm:$0xff]  ;;  %v1219_v34 = vld [vmem:[%s1451_s7 + $0x28] sm:$0xff]  ;;  %v506_v41 = vpack.c.b16 %v499_v38, %v499_v38  ;;  %s432_s15 = sadd.s32 %s1252_s11, %s1251_s17 }
  0x1c   : > { %1240 = vmatpush.bf16.msra.mxu3 %v1228_v15  ;;  %1243 = vmatpush.bf16.msra.mxu1 %v1220_v16  ;;  %v1218_v31 = vld [vmem:[%s1451_s7 + $0x20] sm:$0xff]  ;;  %v1235_v35 = vld [vmem:[%s1462_s12 + $0x28] sm:$0xff]  ;;  %v449_v37 = vld [vmem:[%s1451_s7 + $0x30] sm:$0x3]  ;;  %s1084_s19 = sshll.u32 %s432_s15, 3 }
  0x1d   : > { %1246 = vmatpush.bf16.msra.mxu2 %v1236_v17  ;;  %555 = vmatpush.bf16.msra.mxu0 %v1228_v15  ;;  %v1234_v32 = vld [vmem:[%s1462_s12 + $0x20] sm:$0xff]  ;;  %v616_v39 = vunpack.c.l.b16 %v449_v37  ;;  %v718_v40 = vld [vmem:[%s1462_s12 + $0x30] sm:$0x3]  ;;  %s1518_s20 = scalar_lea.vmem %s1578_s6, %s1084_s19 }
  0x1e   : > { %v750_v43 = vunpack.c.l.b16 %v718_v40 }
  0x1f   : > { %1123 = vmatmul.msk.bf16.vlgmr.msra.gmra.mxu3 %vm522_vm1, %v1223_v18  ;;  %1162 = vmatmul.msk.bf16.vlgmr.msra.gmra.mxu1 %vm522_vm1, %v1215_v19  ;;  %v623_v42 = vpack.c.b16 %v616_v39, %v616_v39 }
  0x20   : > { %1122 = vmatmul.msk.bf16.vlgmr.msra.gmra.mxu0 %vm522_vm1, %v1222_v20  ;;  %1206 = vmatmul.msk.bf16.vlgmr.msra.gmra.mxu2 %vm522_vm1, %v1231_v21  ;;  %v757_v44 = vpack.c.b16 %v750_v43, %v750_v43 }
  0x21   : > { %668 = vmatpush.bf16.msrb.mxu0 %v661_v10 }
  0x25   : > { %669 = vmatpush.bf16.msrb.mxu0 %v1221_v13 }
  0x29   : > { %670 = vmatpush.bf16.msrb.mxu0 %v1220_v16 }
  0x2d   : > { %802 = vmatpush.bf16.msra.mxu0 %v795_v11 }
  0x2f   : > { %1124 = vmatmul.msk.bf16.gmra.mxu3 %vm522_vm1, %v1224_v22  ;;  %1163 = vmatmul.msk.bf16.gmra.mxu1 %vm522_vm1, %v1216_v23 }
  0x30   : > { %1161 = vmatmul.msk.bf16.vlgmr.msrb.gmra.mxu0 %vm522_vm1, %v1214_v24  ;;  %1207 = vmatmul.msk.bf16.gmra.mxu2 %vm522_vm1, %v1232_v25 }
  0x31   : > { %803 = vmatpush.bf16.msra.mxu0 %v1237_v14 }
  0x35   : > { %804 = vmatpush.bf16.msra.mxu0 %v1236_v17 }
  0x3f   : > { %1125 = vmatmul.msk.bf16.gmra.mxu3 %vm522_vm1, %v1225_v26  ;;  %1164 = vmatmul.msk.bf16.gmra.mxu1 %vm522_vm1, %v1217_v27 }
  0x40   : > { %1205 = vmatmul.msk.bf16.vlgmr.msra.gmra.mxu0 %vm522_vm1, %v1230_v28  ;;  %1208 = vmatmul.msk.bf16.gmra.mxu2 %vm522_vm1, %v1233_v29 }
  0x4f   : > { %1126 = vmatmul.msk.bf16.gmra.mxu3 %vm522_vm1, %v1226_v30  ;;  %1165 = vmatmul.msk.bf16.gmra.mxu1 %vm522_vm1, %v1218_v31 }
  0x50   : > { %1209 = vmatmul.msk.bf16.gmra.mxu2 %vm522_vm1, %v1234_v32 }
  0x5f   : > { %1127 = vmatmul.msk.bf16.gmra.mxu3 %vm522_vm1, %v1227_v33  ;;  %1166 = vmatmul.msk.bf16.gmra.mxu1 %vm522_vm1, %v1219_v34 }
  0x60   : > { %1210 = vmatmul.msk.bf16.gmra.mxu2 %vm522_vm1, %v1235_v35 }
  0x6f   : > { %1128 = vmatmul.msk.bf16.gmra.mxu3 %vm522_vm1, %v506_v41  ;;  %1167 = vmatmul.msk.bf16.gmra.mxu1 %vm522_vm1, %v623_v42 }
  0x70   : > { %1211 = vmatmul.msk.bf16.gmra.mxu2 %vm522_vm1, %v757_v44 }
  0x9c   : > { %v677_v45 = vpop.f32.mrf.mxu1 }
  0x9d   : > { %v557_v46 = vpop.f32.mrf.mxu0 }
  0xa2   : > { %v562_v47 = vpop.f32.mrf.mxu3 }
  0xa3   : > { %v678_v49 = vadd.f32 %v677_v45, %v562_v47  ;;  %v811_v52 = vpop.f32.mrf.mxu2 }
  0xa4   : > { %v679_v48 = vpop.f32.mrf.mxu1 }
  0xa5   : > { %v559_v50 = vpop.f32.mrf.mxu0  ;;  %v842_v53 = vadd.f32 %v811_v52, %v678_v49 }
  0xa7   : > { %v859_v56 = vmul.f32 %v1506_v51, %v842_v53 }
  0xa9   : > { %v876_v58 = vadd.f32 %v1511_v54, %v859_v56 }
  0xaa   : > { %v564_v55 = vpop.f32.mrf.mxu3 }
  0xab   : > { %v680_v59 = vadd.f32 %v679_v48, %v564_v55  ;;  %v889_v61 = vmax.f32 %v876_v58, 0.0  ;;  %v813_v62 = vpop.f32.mrf.mxu2 }
  0xac   : > { %v682_v57 = vpop.f32.mrf.mxu1 }
  0xad   : > { %v672_v60 = vpop.f32.mrf.mxu0  ;;  %902 = vst [vmem:[%s1518_s20 + $0x10] sm:$0xff] %v889_v61  ;;  %v843_v63 = vadd.f32 %v813_v62, %v680_v59 }
  0xae   : > { %v673_v9 = vadd.f32 %v672_v60, %v557_v46 }
  0xaf   : > { %v860_v1 = vmul.f32 %v1506_v51, %v843_v63 }
  0xb1   : > { %v877_v3 = vadd.f32 %v1511_v54, %v860_v1 }
  0xb2   : > { %v567_v0 = vpop.f32.mrf.mxu3 }
  0xb3   : > { %v683_v4 = vadd.f32 %v682_v57, %v567_v0  ;;  %v890_v6 = vmax.f32 %v877_v3, 0.0  ;;  %v816_v7 = vpop.f32.mrf.mxu2 }
  0xb4   : > { %v684_v2 = vpop.f32.mrf.mxu1 }
  0xb5   : > { %v674_v5 = vpop.f32.mrf.mxu0  ;;  %903 = vst [vmem:[%s1518_s20 + $0x18] sm:$0xff] %v890_v6  ;;  %v844_v8 = vadd.f32 %v816_v7, %v683_v4 }
  0xb6   : > { %v675_v21 = vadd.f32 %v674_v5, %v559_v50 }
  0xb7   : > { %v861_v11 = vmul.f32 %v1506_v51, %v844_v8 }
  0xb9   : > { %v878_v13 = vadd.f32 %v1511_v54, %v861_v11 }
  0xba   : > { %v569_v10 = vpop.f32.mrf.mxu3 }
  0xbb   : > { %v685_v14 = vadd.f32 %v684_v2, %v569_v10  ;;  %v891_v17 = vmax.f32 %v878_v13, 0.0  ;;  %v818_v18 = vpop.f32.mrf.mxu2 }
  0xbc   : > { %v687_v12 = vpop.f32.mrf.mxu1 }
  0xbd   : > { %v806_v15 = vpop.f32.mrf.mxu0  ;;  %904 = vst [vmem:[%s1518_s20 + $0x20] sm:$0xff] %v891_v17  ;;  %v845_v20 = vadd.f32 %v818_v18, %v685_v14 }
  0xbe   : > { %v840_v16 = vadd.f32 %v806_v15, %v673_v9 }
  0xbf   : > { %v862_v24 = vmul.f32 %v1506_v51, %v845_v20 }
  0xc0   : > { %v857_v19 = vmul.f32 %v1506_v51, %v840_v16 }
  0xc1   : > { %v879_v27 = vadd.f32 %v1511_v54, %v862_v24 }
  0xc2   : > { %v572_v22 = vpop.f32.mrf.mxu3  ;;  %v874_v23 = vadd.f32 %v1511_v54, %v857_v19 }
  0xc3   : > { %v688_v28 = vadd.f32 %v687_v12, %v572_v22  ;;  %v892_v31 = vmax.f32 %v879_v27, 0.0  ;;  %v821_v32 = vpop.f32.mrf.mxu2 }
  0xc4   : > { %v689_v25 = vpop.f32.mrf.mxu1  ;;  %v887_v26 = vmax.f32 %v874_v23, 0.0 }
  0xc5   : > { %v808_v29 = vpop.f32.mrf.mxu0  ;;  %905 = vst [vmem:[%s1518_s20 + $0x28] sm:$0xff] %v892_v31  ;;  %v846_v34 = vadd.f32 %v821_v32, %v688_v28 }
  0xc6   : > { %900 = vst [vmem:[%s1518_s20] sm:$0xff] %v887_v26  ;;  %v841_v30 = vadd.f32 %v808_v29, %v675_v21 }
  0xc7   : > { %v863_v37 = vmul.f32 %v1506_v51, %v846_v34 }
  0xc8   : > { %v858_v33 = vmul.f32 %v1506_v51, %v841_v30 }
  0xc9   : > { %v880_v40 = vadd.f32 %v1511_v54, %v863_v37 }
  0xca   : > { %v574_v35 = vpop.f32.mrf.mxu3  ;;  %v875_v36 = vadd.f32 %v1511_v54, %v858_v33 }
  0xcb   : > { %v690_v41 = vadd.f32 %v689_v25, %v574_v35  ;;  %v893_v42 = vmax.f32 %v880_v40, 0.0  ;;  %v823_v43 = vpop.f32.mrf.mxu2 }
  0xcc   : > { %v692_v38 = vpop.f32.mrf.mxu1  ;;  %v888_v39 = vmax.f32 %v875_v36, 0.0 }
  0xcd   : > { %906 = vst [vmem:[%s1518_s20 + $0x30] sm:$0xff] %v893_v42  ;;  %v847_v44 = vadd.f32 %v823_v43, %v690_v41 }
  0xce   : > { %901 = vst [vmem:[%s1518_s20 + $0x8] sm:$0xff] %v888_v39 }
  0xcf   : > { %v864_v46 = vmul.f32 %v1506_v51, %v847_v44 }
  0xd1   : > { %v881_v48 = vadd.f32 %v1511_v54, %v864_v46 }
  0xd2   : > { %v577_v45 = vpop.f32.mrf.mxu3 }
  0xd3   : > { %v693_v49 = vadd.f32 %v692_v38, %v577_v45  ;;  %v894_v50 = vmax.f32 %v881_v48, 0.0  ;;  %v826_v52 = vpop.f32.mrf.mxu2 }
  0xd4   : > { %v694_v47 = vpop.f32.mrf.mxu1 }
  0xd5   : > { %907 = vst [vmem:[%s1518_s20 + $0x38] sm:$0xff] %v894_v50  ;;  %v848_v53 = vadd.f32 %v826_v52, %v693_v49 }
  0xd7   : > { %v865_v56 = vmul.f32 %v1506_v51, %v848_v53 }
  0xd9   : > { %v882_v58 = vadd.f32 %v1511_v54, %v865_v56 }
  0xda   : > { %v579_v55 = vpop.f32.mrf.mxu3 }
  0xdb   : > { %v695_v59 = vadd.f32 %v694_v47, %v579_v55  ;;  %v895_v60 = vmax.f32 %v882_v58, 0.0  ;;  %v828_v61 = vpop.f32.mrf.mxu2 }
  0xdc   : > { %v697_v57 = vpop.f32.mrf.mxu1 }
  0xdd   : > { %908 = vst [vmem:[%s1518_s20 + $0x40] sm:$0xff] %v895_v60  ;;  %v849_v62 = vadd.f32 %v828_v61, %v695_v59 }
  0xdf   : > { %v866_v0 = vmul.f32 %v1506_v51, %v849_v62 }
  0xe1   : > { %v883_v2 = vadd.f32 %v1511_v54, %v866_v0 }
  0xe2   : > { %v582_v63 = vpop.f32.mrf.mxu3 }
  0xe3   : > { %v698_v3 = vadd.f32 %v697_v57, %v582_v63  ;;  %v896_v4 = vmax.f32 %v883_v2, 0.0  ;;  %v831_v5 = vpop.f32.mrf.mxu2 }
  0xe4   : > { %v699_v1 = vpop.f32.mrf.mxu1 }
  0xe5   : > { %909 = vst [vmem:[%s1518_s20 + $0x48] sm:$0xff] %v896_v4  ;;  %v850_v6 = vadd.f32 %v831_v5, %v698_v3 }
  0xe7   : > { %v867_v8 = vmul.f32 %v1506_v51, %v850_v6 }
  0xe9   : > { %v884_v10 = vadd.f32 %v1511_v54, %v867_v8 }
  0xea   : > { %v584_v7 = vpop.f32.mrf.mxu3 }
  0xeb   : > { %v700_v11 = vadd.f32 %v699_v1, %v584_v7  ;;  %v897_v12 = vmax.f32 %v884_v10, 0.0  ;;  %v833_v13 = vpop.f32.mrf.mxu2 }
  0xec   : > { %v702_v9 = vpop.f32.mrf.mxu1 }
  0xed   : > { %910 = vst [vmem:[%s1518_s20 + $0x50] sm:$0xff] %v897_v12  ;;  %v851_v14 = vadd.f32 %v833_v13, %v700_v11 }
  0xef   : > { %v868_v16 = vmul.f32 %v1506_v51, %v851_v14 }
  0xf1   : > { %v885_v18 = vadd.f32 %v1511_v54, %v868_v16 }
  0xf2   : > { %v587_v15 = vpop.f32.mrf.mxu3 }
  0xf3   : > { %v703_v19 = vadd.f32 %v702_v9, %v587_v15  ;;  %v898_v20 = vmax.f32 %v885_v18, 0.0  ;;  %v836_v21 = vpop.f32.mrf.mxu2 }
  0xf4   : > { %v704_v17 = vpop.f32.mrf.mxu1 }
  0xf5   : > { %911 = vst [vmem:[%s1518_s20 + $0x58] sm:$0xff] %v898_v20  ;;  %v852_v22 = vadd.f32 %v836_v21, %v703_v19 }
  0xf7   : > { %v869_v24 = vmul.f32 %v1506_v51, %v852_v22 }
  0xf9   : > { %v886_v25 = vadd.f32 %v1511_v54, %v869_v24 }
  0xfa   : > { %v589_v23 = vpop.f32.mrf.mxu3 }
  0xfb   : > { %v899_v26 = vmax.f32 %v886_v25, 0.0  ;;  %v838_v27 = vpop.f32.mrf.mxu2 }
  0xfd   : > { %912 = vst [vmem:[%s1518_s20 + $0x60] sm:$0xf] %v899_v26 }
  0xfe PF: > { %s16_s25 = sadd.s32 1, %s1333_s25   ;;  %s1579_s21 = smov %s1325_s23 }
  0xff   : > { %p13_p10 = scmp.ge.s32.totalorder %s16_s25, 22   ;;  %s1580_s22 = smov %s1329_s24 }
 0x100   : > { %s1581_s23 = smov %s1584_s26  ;;  %s1582_s24 = smov %s1588_s27 }
 0x101   :  { %15 = sbr.rel (!%p13_p10) target bundleno = 3 (0x3), region = 82 }

</bundles_post_ra>
